<compile_context>
chip_gen: v6e
topology: v6e:2x2x1
jax: 0.10.0
libtpu: 0.0.40
codegen_flags: <defaults>
</compile_context>

<pallas_src>
import functools

import jax
import jax.numpy as jnp
from jax import lax
from jax.experimental import pallas as pl
from jax.experimental.pallas import tpu as pltpu

PAD = int(224 / 21)  # = 10, as in RandomShiftsAug.__init__


def _shift_kernel(sy_ref, sx_ref, x_ref, o_ref, *, pad, imgs_per_step, c, h, w):
    # sy_ref / sx_ref : SMEM int32 (n,) integer shifts in [0, 2*pad]
    #                   (scalar prefetch).
    # x_ref           : VMEM input block  (imgs_per_step, c, h, w)
    # o_ref           : VMEM output block (imgs_per_step, c, h, w)
    g = pl.program_id(0)
    f32 = jnp.float32

    # Shared iotas for building the per-image one-hot selection matrices.
    rr = lax.broadcasted_iota(jnp.int32, (h, h), 0)   # destination row r
    rk = lax.broadcasted_iota(jnp.int32, (h, h), 1)   # source row k
    ck = lax.broadcasted_iota(jnp.int32, (w, w), 0)   # source col k
    cj = lax.broadcasted_iota(jnp.int32, (w, w), 1)   # destination col j

    for i in range(imgs_per_step):                    # static unroll, small
        b = g * imgs_per_step + i
        dy = sy_ref[b] - pad
        dx = sx_ref[b] - pad

        # One-hot selection matrices implementing the integer shift with
        # replicate clamping (== replicate pad followed by a shifted crop).
        #   (R @ img)[r, :] = img[clamp(r+dy, 0, h-1), :]
        #   (t @ S)[:, j]   = t[:, clamp(j+dx, 0, w-1)]
        R = (rk == jnp.clip(rr + dy, 0, h - 1)).astype(f32)   # (h, h)
        S = (ck == jnp.clip(cj + dx, 0, w - 1)).astype(f32)   # (w, w)

        for ci in range(c):                           # static unroll, c small
            img = x_ref[i, ci].astype(f32)            # (h, w)
            t = jnp.dot(R, img, preferred_element_type=f32)   # row shift
            o = jnp.dot(t, S, preferred_element_type=f32)     # col shift
            o_ref[i, ci] = o.astype(o_ref.dtype)


def _sample_shift(key, n, pad):
    # torch.randint(0, 2*pad+1, (n, 1, 1, 2)) -> per-image (sx, sy) ints.
    # TODO(synk): jax.random stream is not bit-reproducible against torch's
    # RNG; the distribution/semantics match.
    s = jax.random.randint(key, (n, 2), 0, 2 * pad + 1, dtype=jnp.int32)
    return s[:, 0], s[:, 1]  # sx, sy


def random_shifts_aug(x, key, pad=PAD, max_images_per_step=4):
    n, c, h, w = x.shape
    assert h == w
    if not pad:
        return x

    sx, sy = _sample_shift(key, n, pad)

    # Images per grid step: largest divisor of n that is <= cap. Amortizes the
    # per-grid-step overhead while keeping (in + out) double-buffered blocks
    # tiny compared to the 32MiB default scoped VMEM (also fine on v7x).
    bpi = 1
    for d in range(1, max_images_per_step + 1):
        if n % d == 0:
            bpi = d

    kernel = functools.partial(
        _shift_kernel, pad=pad, imgs_per_step=bpi, c=c, h=h, w=w)

    return pl.pallas_call(
        kernel,
        out_shape=jax.ShapeDtypeStruct((n, c, h, w), x.dtype),
        grid_spec=pltpu.PrefetchScalarGridSpec(
            num_scalar_prefetch=2,
            grid=(n // bpi,),
            in_specs=[pl.BlockSpec((bpi, c, h, w),
                                   lambda g, sy_r, sx_r: (g, 0, 0, 0))],
            out_specs=pl.BlockSpec((bpi, c, h, w),
                                   lambda g, sy_r, sx_r: (g, 0, 0, 0)),
        ),
        compiler_params=pltpu.CompilerParams(
            dimension_semantics=("parallel",)),
    )(sy, sx, x)


if __name__ == "__main__":
    key = jax.random.PRNGKey(0)
    kx, ks = jax.random.split(key)
    # Image-like data in [0, 1).
    x = jax.random.uniform(kx, (2, 4, 16, 16), dtype=jnp.float32)

    out = jax.block_until_ready(random_shifts_aug(x, ks))
    assert out.shape == x.shape and out.dtype == x.dtype

    # Reference: integer-pixel shift == shifted crop of the replicate-padded
    # image (exactly the grid_sample result for integer shifts).
    n, c, h, w = x.shape
    sx, sy = _sample_shift(ks, n, PAD)
    xp = jnp.pad(x, ((0, 0), (0, 0), (PAD, PAD), (PAD, PAD)), mode="edge")
    ref = jnp.stack([
        xp[i, :, int(sy[i]):int(sy[i]) + h, int(sx[i]):int(sx[i]) + w]
        for i in range(n)
    ])
    err = float(jnp.max(jnp.abs(out - ref)))
    assert err < 1e-2, f"max abs err {err}"
    print("KERNEL_OK")
</pallas_src>

<mosaic_0001>
module attributes {stable_mosaic.version = 11 : i64} {
  func.func @_shift_kernel(%arg0: i32, %arg1: memref<2xi32, #tpu.memory_space<smem>>, %arg2: memref<2xi32, #tpu.memory_space<smem>>, %arg3: memref<2x4x16x16xf32, #tpu.memory_space<vmem>>, %arg4: memref<2x4x16x16xf32, #tpu.memory_space<vmem>>) attributes {dimension_semantics = [#tpu.dimension_semantics<parallel>], iteration_bounds = array<i64: 1>, scalar_prefetch = 2 : i64, scratch_operands = 0 : i64, tpu.core_type = #tpu.core_type<tc>, window_params = [{transform_indices = @transform_0, window_bounds = array<i64: 2, 4, 16, 16>}, {transform_indices = @transform_1, window_bounds = array<i64: 2, 4, 16, 16>}]} {
    %0 = tpu.iota {dimensions = array<i32: 0>} : vector<16x16xi32>
    %1 = tpu.iota {dimensions = array<i32: 1>} : vector<16x16xi32>
    %2 = tpu.iota {dimensions = array<i32: 0>} : vector<16x16xi32>
    %3 = tpu.iota {dimensions = array<i32: 1>} : vector<16x16xi32>
    %c2_i32 = arith.constant 2 : i32
    %4 = arith.muli %arg0, %c2_i32 : i32
    %c0_i32 = arith.constant 0 : i32
    %5 = arith.addi %4, %c0_i32 : i32
    %6 = arith.index_cast %5 : i32 to index
    %7 = memref.load %arg1[%6] : memref<2xi32, #tpu.memory_space<smem>>
    %c10_i32 = arith.constant 10 : i32
    %8 = arith.subi %7, %c10_i32 : i32
    %9 = arith.index_cast %5 : i32 to index
    %10 = memref.load %arg2[%9] : memref<2xi32, #tpu.memory_space<smem>>
    %c10_i32_0 = arith.constant 10 : i32
    %11 = arith.subi %10, %c10_i32_0 : i32
    %12 = vector.broadcast %8 : i32 to vector<16x16xi32>
    %13 = arith.addi %0, %12 : vector<16x16xi32>
    %c0_i32_1 = arith.constant 0 : i32
    %c15_i32 = arith.constant 15 : i32
    %14 = vector.broadcast %c0_i32_1 : i32 to vector<16x16xi32>
    %15 = arith.maxsi %14, %13 : vector<16x16xi32>
    %16 = vector.broadcast %c15_i32 : i32 to vector<16x16xi32>
    %17 = arith.minsi %16, %15 : vector<16x16xi32>
    %18 = arith.cmpi eq, %1, %17 : vector<16x16xi32>
    %19 = arith.extui %18 : vector<16x16xi1> to vector<16x16xi32>
    %20 = arith.sitofp %19 : vector<16x16xi32> to vector<16x16xf32>
    %21 = vector.broadcast %11 : i32 to vector<16x16xi32>
    %22 = arith.addi %3, %21 : vector<16x16xi32>
    %c0_i32_2 = arith.constant 0 : i32
    %c15_i32_3 = arith.constant 15 : i32
    %23 = vector.broadcast %c0_i32_2 : i32 to vector<16x16xi32>
    %24 = arith.maxsi %23, %22 : vector<16x16xi32>
    %25 = vector.broadcast %c15_i32_3 : i32 to vector<16x16xi32>
    %26 = arith.minsi %25, %24 : vector<16x16xi32>
    %27 = arith.cmpi eq, %2, %26 : vector<16x16xi32>
    %28 = arith.extui %27 : vector<16x16xi1> to vector<16x16xi32>
    %29 = arith.sitofp %28 : vector<16x16xi32> to vector<16x16xf32>
    %c0 = arith.constant 0 : index
    %c0_4 = arith.constant 0 : index
    %c0_5 = arith.constant 0 : index
    %c0_6 = arith.constant 0 : index
    %30 = vector.load %arg3[%c0, %c0_4, %c0_5, %c0_6] : memref<2x4x16x16xf32, #tpu.memory_space<vmem>>, vector<1x1x16x16xf32>
    %31 = vector.shape_cast %30 : vector<1x1x16x16xf32> to vector<16x16xf32>
    %cst = arith.constant dense<0.000000e+00> : vector<16x16xf32>
    %32 = tpu.matmul %20, %31, %cst {dimension_numbers = #tpu.dot_dimension_numbers<[1], [0], [0], [1], [0, 0, 1, 1], [], []>} : vector<16x16xf32>, vector<16x16xf32>, vector<16x16xf32> -> vector<16x16xf32>
    %cst_7 = arith.constant dense<0.000000e+00> : vector<16x16xf32>
    %33 = tpu.matmul %32, %29, %cst_7 {dimension_numbers = #tpu.dot_dimension_numbers<[1], [0], [0], [1], [0, 0, 1, 1], [], []>} : vector<16x16xf32>, vector<16x16xf32>, vector<16x16xf32> -> vector<16x16xf32>
    %c0_8 = arith.constant 0 : index
    %c0_9 = arith.constant 0 : index
    %c0_10 = arith.constant 0 : index
    %c0_11 = arith.constant 0 : index
    %34 = vector.load %arg4[%c0_8, %c0_9, %c0_10, %c0_11] : memref<2x4x16x16xf32, #tpu.memory_space<vmem>>, vector<1x1x16x16xf32>
    %35 = vector.shape_cast %34 : vector<1x1x16x16xf32> to vector<16x16xf32>
    %36 = vector.shape_cast %33 : vector<16x16xf32> to vector<1x1x16x16xf32>
    tpu.vector_store %arg4[%c0_8, %c0_9, %c0_10, %c0_11], %36 {strides = array<i32>} : memref<2x4x16x16xf32, #tpu.memory_space<vmem>>, vector<1x1x16x16xf32>,
    %c0_12 = arith.constant 0 : index
    %c1 = arith.constant 1 : index
    %c0_13 = arith.constant 0 : index
    %c0_14 = arith.constant 0 : index
    %37 = vector.load %arg3[%c0_12, %c1, %c0_13, %c0_14] : memref<2x4x16x16xf32, #tpu.memory_space<vmem>>, vector<1x1x16x16xf32>
    %38 = vector.shape_cast %37 : vector<1x1x16x16xf32> to vector<16x16xf32>
    %cst_15 = arith.constant dense<0.000000e+00> : vector<16x16xf32>
    %39 = tpu.matmul %20, %38, %cst_15 {dimension_numbers = #tpu.dot_dimension_numbers<[1], [0], [0], [1], [0, 0, 1, 1], [], []>} : vector<16x16xf32>, vector<16x16xf32>, vector<16x16xf32> -> vector<16x16xf32>
    %cst_16 = arith.constant dense<0.000000e+00> : vector<16x16xf32>
    %40 = tpu.matmul %39, %29, %cst_16 {dimension_numbers = #tpu.dot_dimension_numbers<[1], [0], [0], [1], [0, 0, 1, 1], [], []>} : vector<16x16xf32>, vector<16x16xf32>, vector<16x16xf32> -> vector<16x16xf32>
    %c0_17 = arith.constant 0 : index
    %c1_18 = arith.constant 1 : index
    %c0_19 = arith.constant 0 : index
    %c0_20 = arith.constant 0 : index
    %41 = vector.load %arg4[%c0_17, %c1_18, %c0_19, %c0_20] : memref<2x4x16x16xf32, #tpu.memory_space<vmem>>, vector<1x1x16x16xf32>
    %42 = vector.shape_cast %41 : vector<1x1x16x16xf32> to vector<16x16xf32>
    %43 = vector.shape_cast %40 : vector<16x16xf32> to vector<1x1x16x16xf32>
    tpu.vector_store %arg4[%c0_17, %c1_18, %c0_19, %c0_20], %43 {strides = array<i32>} : memref<2x4x16x16xf32, #tpu.memory_space<vmem>>, vector<1x1x16x16xf32>,
    %c0_21 = arith.constant 0 : index
    %c2 = arith.constant 2 : index
    %c0_22 = arith.constant 0 : index
    %c0_23 = arith.constant 0 : index
    %44 = vector.load %arg3[%c0_21, %c2, %c0_22, %c0_23] : memref<2x4x16x16xf32, #tpu.memory_space<vmem>>, vector<1x1x16x16xf32>
    %45 = vector.shape_cast %44 : vector<1x1x16x16xf32> to vector<16x16xf32>
    %cst_24 = arith.constant dense<0.000000e+00> : vector<16x16xf32>
    %46 = tpu.matmul %20, %45, %cst_24 {dimension_numbers = #tpu.dot_dimension_numbers<[1], [0], [0], [1], [0, 0, 1, 1], [], []>} : vector<16x16xf32>, vector<16x16xf32>, vector<16x16xf32> -> vector<16x16xf32>
    %cst_25 = arith.constant dense<0.000000e+00> : vector<16x16xf32>
    %47 = tpu.matmul %46, %29, %cst_25 {dimension_numbers = #tpu.dot_dimension_numbers<[1], [0], [0], [1], [0, 0, 1, 1], [], []>} : vector<16x16xf32>, vector<16x16xf32>, vector<16x16xf32> -> vector<16x16xf32>
    %c0_26 = arith.constant 0 : index
    %c2_27 = arith.constant 2 : index
    %c0_28 = arith.constant 0 : index
    %c0_29 = arith.constant 0 : index
    %48 = vector.load %arg4[%c0_26, %c2_27, %c0_28, %c0_29] : memref<2x4x16x16xf32, #tpu.memory_space<vmem>>, vector<1x1x16x16xf32>
    %49 = vector.shape_cast %48 : vector<1x1x16x16xf32> to vector<16x16xf32>
    %50 = vector.shape_cast %47 : vector<16x16xf32> to vector<1x1x16x16xf32>
    tpu.vector_store %arg4[%c0_26, %c2_27, %c0_28, %c0_29], %50 {strides = array<i32>} : memref<2x4x16x16xf32, #tpu.memory_space<vmem>>, vector<1x1x16x16xf32>,
    %c0_30 = arith.constant 0 : index
    %c3 = arith.constant 3 : index
    %c0_31 = arith.constant 0 : index
    %c0_32 = arith.constant 0 : index
    %51 = vector.load %arg3[%c0_30, %c3, %c0_31, %c0_32] : memref<2x4x16x16xf32, #tpu.memory_space<vmem>>, vector<1x1x16x16xf32>
    %52 = vector.shape_cast %51 : vector<1x1x16x16xf32> to vector<16x16xf32>
    %cst_33 = arith.constant dense<0.000000e+00> : vector<16x16xf32>
    %53 = tpu.matmul %20, %52, %cst_33 {dimension_numbers = #tpu.dot_dimension_numbers<[1], [0], [0], [1], [0, 0, 1, 1], [], []>} : vector<16x16xf32>, vector<16x16xf32>, vector<16x16xf32> -> vector<16x16xf32>
    %cst_34 = arith.constant dense<0.000000e+00> : vector<16x16xf32>
    %54 = tpu.matmul %53, %29, %cst_34 {dimension_numbers = #tpu.dot_dimension_numbers<[1], [0], [0], [1], [0, 0, 1, 1], [], []>} : vector<16x16xf32>, vector<16x16xf32>, vector<16x16xf32> -> vector<16x16xf32>
    %c0_35 = arith.constant 0 : index
    %c3_36 = arith.constant 3 : index
    %c0_37 = arith.constant 0 : index
    %c0_38 = arith.constant 0 : index
    %55 = vector.load %arg4[%c0_35, %c3_36, %c0_37, %c0_38] : memref<2x4x16x16xf32, #tpu.memory_space<vmem>>, vector<1x1x16x16xf32>
    %56 = vector.shape_cast %55 : vector<1x1x16x16xf32> to vector<16x16xf32>
    %57 = vector.shape_cast %54 : vector<16x16xf32> to vector<1x1x16x16xf32>
    tpu.vector_store %arg4[%c0_35, %c3_36, %c0_37, %c0_38], %57 {strides = array<i32>} : memref<2x4x16x16xf32, #tpu.memory_space<vmem>>, vector<1x1x16x16xf32>,
    %c2_i32_39 = arith.constant 2 : i32
    %58 = arith.muli %arg0, %c2_i32_39 : i32
    %c1_i32 = arith.constant 1 : i32
    %59 = arith.addi %58, %c1_i32 : i32
    %60 = arith.index_cast %59 : i32 to index
    %61 = memref.load %arg1[%60] : memref<2xi32, #tpu.memory_space<smem>>
    %c10_i32_40 = arith.constant 10 : i32
    %62 = arith.subi %61, %c10_i32_40 : i32
    %63 = arith.index_cast %59 : i32 to index
    %64 = memref.load %arg2[%63] : memref<2xi32, #tpu.memory_space<smem>>
    %c10_i32_41 = arith.constant 10 : i32
    %65 = arith.subi %64, %c10_i32_41 : i32
    %66 = vector.broadcast %62 : i32 to vector<16x16xi32>
    %67 = arith.addi %0, %66 : vector<16x16xi32>
    %c0_i32_42 = arith.constant 0 : i32
    %c15_i32_43 = arith.constant 15 : i32
    %68 = vector.broadcast %c0_i32_42 : i32 to vector<16x16xi32>
    %69 = arith.maxsi %68, %67 : vector<16x16xi32>
    %70 = vector.broadcast %c15_i32_43 : i32 to vector<16x16xi32>
    %71 = arith.minsi %70, %69 : vector<16x16xi32>
    %72 = arith.cmpi eq, %1, %71 : vector<16x16xi32>
    %73 = arith.extui %72 : vector<16x16xi1> to vector<16x16xi32>
    %74 = arith.sitofp %73 : vector<16x16xi32> to vector<16x16xf32>
    %75 = vector.broadcast %65 : i32 to vector<16x16xi32>
    %76 = arith.addi %3, %75 : vector<16x16xi32>
    %c0_i32_44 = arith.constant 0 : i32
    %c15_i32_45 = arith.constant 15 : i32
    %77 = vector.broadcast %c0_i32_44 : i32 to vector<16x16xi32>
    %78 = arith.maxsi %77, %76 : vector<16x16xi32>
    %79 = vector.broadcast %c15_i32_45 : i32 to vector<16x16xi32>
    %80 = arith.minsi %79, %78 : vector<16x16xi32>
    %81 = arith.cmpi eq, %2, %80 : vector<16x16xi32>
    %82 = arith.extui %81 : vector<16x16xi1> to vector<16x16xi32>
    %83 = arith.sitofp %82 : vector<16x16xi32> to vector<16x16xf32>
    %c1_46 = arith.constant 1 : index
    %c0_47 = arith.constant 0 : index
    %c0_48 = arith.constant 0 : index
    %c0_49 = arith.constant 0 : index
    %84 = vector.load %arg3[%c1_46, %c0_47, %c0_48, %c0_49] : memref<2x4x16x16xf32, #tpu.memory_space<vmem>>, vector<1x1x16x16xf32>
    %85 = vector.shape_cast %84 : vector<1x1x16x16xf32> to vector<16x16xf32>
    %cst_50 = arith.constant dense<0.000000e+00> : vector<16x16xf32>
    %86 = tpu.matmul %74, %85, %cst_50 {dimension_numbers = #tpu.dot_dimension_numbers<[1], [0], [0], [1], [0, 0, 1, 1], [], []>} : vector<16x16xf32>, vector<16x16xf32>, vector<16x16xf32> -> vector<16x16xf32>
    %cst_51 = arith.constant dense<0.000000e+00> : vector<16x16xf32>
    %87 = tpu.matmul %86, %83, %cst_51 {dimension_numbers = #tpu.dot_dimension_numbers<[1], [0], [0], [1], [0, 0, 1, 1], [], []>} : vector<16x16xf32>, vector<16x16xf32>, vector<16x16xf32> -> vector<16x16xf32>
    %c1_52 = arith.constant 1 : index
    %c0_53 = arith.constant 0 : index
    %c0_54 = arith.constant 0 : index
    %c0_55 = arith.constant 0 : index
    %88 = vector.load %arg4[%c1_52, %c0_53, %c0_54, %c0_55] : memref<2x4x16x16xf32, #tpu.memory_space<vmem>>, vector<1x1x16x16xf32>
    %89 = vector.shape_cast %88 : vector<1x1x16x16xf32> to vector<16x16xf32>
    %90 = vector.shape_cast %87 : vector<16x16xf32> to vector<1x1x16x16xf32>
    tpu.vector_store %arg4[%c1_52, %c0_53, %c0_54, %c0_55], %90 {strides = array<i32>} : memref<2x4x16x16xf32, #tpu.memory_space<vmem>>, vector<1x1x16x16xf32>,
    %c1_56 = arith.constant 1 : index
    %c1_57 = arith.constant 1 : index
    %c0_58 = arith.constant 0 : index
    %c0_59 = arith.constant 0 : index
    %91 = vector.load %arg3[%c1_56, %c1_57, %c0_58, %c0_59] : memref<2x4x16x16xf32, #tpu.memory_space<vmem>>, vector<1x1x16x16xf32>
    %92 = vector.shape_cast %91 : vector<1x1x16x16xf32> to vector<16x16xf32>
    %cst_60 = arith.constant dense<0.000000e+00> : vector<16x16xf32>
    %93 = tpu.matmul %74, %92, %cst_60 {dimension_numbers = #tpu.dot_dimension_numbers<[1], [0], [0], [1], [0, 0, 1, 1], [], []>} : vector<16x16xf32>, vector<16x16xf32>, vector<16x16xf32> -> vector<16x16xf32>
    %cst_61 = arith.constant dense<0.000000e+00> : vector<16x16xf32>
    %94 = tpu.matmul %93, %83, %cst_61 {dimension_numbers = #tpu.dot_dimension_numbers<[1], [0], [0], [1], [0, 0, 1, 1], [], []>} : vector<16x16xf32>, vector<16x16xf32>, vector<16x16xf32> -> vector<16x16xf32>
    %c1_62 = arith.constant 1 : index
    %c1_63 = arith.constant 1 : index
    %c0_64 = arith.constant 0 : index
    %c0_65 = arith.constant 0 : index
    %95 = vector.load %arg4[%c1_62, %c1_63, %c0_64, %c0_65] : memref<2x4x16x16xf32, #tpu.memory_space<vmem>>, vector<1x1x16x16xf32>
    %96 = vector.shape_cast %95 : vector<1x1x16x16xf32> to vector<16x16xf32>
    %97 = vector.shape_cast %94 : vector<16x16xf32> to vector<1x1x16x16xf32>
    tpu.vector_store %arg4[%c1_62, %c1_63, %c0_64, %c0_65], %97 {strides = array<i32>} : memref<2x4x16x16xf32, #tpu.memory_space<vmem>>, vector<1x1x16x16xf32>,
    %c1_66 = arith.constant 1 : index
    %c2_67 = arith.constant 2 : index
    %c0_68 = arith.constant 0 : index
    %c0_69 = arith.constant 0 : index
    %98 = vector.load %arg3[%c1_66, %c2_67, %c0_68, %c0_69] : memref<2x4x16x16xf32, #tpu.memory_space<vmem>>, vector<1x1x16x16xf32>
    %99 = vector.shape_cast %98 : vector<1x1x16x16xf32> to vector<16x16xf32>
    %cst_70 = arith.constant dense<0.000000e+00> : vector<16x16xf32>
    %100 = tpu.matmul %74, %99, %cst_70 {dimension_numbers = #tpu.dot_dimension_numbers<[1], [0], [0], [1], [0, 0, 1, 1], [], []>} : vector<16x16xf32>, vector<16x16xf32>, vector<16x16xf32> -> vector<16x16xf32>
    %cst_71 = arith.constant dense<0.000000e+00> : vector<16x16xf32>
    %101 = tpu.matmul %100, %83, %cst_71 {dimension_numbers = #tpu.dot_dimension_numbers<[1], [0], [0], [1], [0, 0, 1, 1], [], []>} : vector<16x16xf32>, vector<16x16xf32>, vector<16x16xf32> -> vector<16x16xf32>
    %c1_72 = arith.constant 1 : index
    %c2_73 = arith.constant 2 : index
    %c0_74 = arith.constant 0 : index
    %c0_75 = arith.constant 0 : index
    %102 = vector.load %arg4[%c1_72, %c2_73, %c0_74, %c0_75] : memref<2x4x16x16xf32, #tpu.memory_space<vmem>>, vector<1x1x16x16xf32>
    %103 = vector.shape_cast %102 : vector<1x1x16x16xf32> to vector<16x16xf32>
    %104 = vector.shape_cast %101 : vector<16x16xf32> to vector<1x1x16x16xf32>
    tpu.vector_store %arg4[%c1_72, %c2_73, %c0_74, %c0_75], %104 {strides = array<i32>} : memref<2x4x16x16xf32, #tpu.memory_space<vmem>>, vector<1x1x16x16xf32>,
    %c1_76 = arith.constant 1 : index
    %c3_77 = arith.constant 3 : index
    %c0_78 = arith.constant 0 : index
    %c0_79 = arith.constant 0 : index
    %105 = vector.load %arg3[%c1_76, %c3_77, %c0_78, %c0_79] : memref<2x4x16x16xf32, #tpu.memory_space<vmem>>, vector<1x1x16x16xf32>
    %106 = vector.shape_cast %105 : vector<1x1x16x16xf32> to vector<16x16xf32>
    %cst_80 = arith.constant dense<0.000000e+00> : vector<16x16xf32>
    %107 = tpu.matmul %74, %106, %cst_80 {dimension_numbers = #tpu.dot_dimension_numbers<[1], [0], [0], [1], [0, 0, 1, 1], [], []>} : vector<16x16xf32>, vector<16x16xf32>, vector<16x16xf32> -> vector<16x16xf32>
    %cst_81 = arith.constant dense<0.000000e+00> : vector<16x16xf32>
    %108 = tpu.matmul %107, %83, %cst_81 {dimension_numbers = #tpu.dot_dimension_numbers<[1], [0], [0], [1], [0, 0, 1, 1], [], []>} : vector<16x16xf32>, vector<16x16xf32>, vector<16x16xf32> -> vector<16x16xf32>
    %c1_82 = arith.constant 1 : index
    %c3_83 = arith.constant 3 : index
    %c0_84 = arith.constant 0 : index
    %c0_85 = arith.constant 0 : index
    %109 = vector.load %arg4[%c1_82, %c3_83, %c0_84, %c0_85] : memref<2x4x16x16xf32, #tpu.memory_space<vmem>>, vector<1x1x16x16xf32>
    %110 = vector.shape_cast %109 : vector<1x1x16x16xf32> to vector<16x16xf32>
    %111 = vector.shape_cast %108 : vector<16x16xf32> to vector<1x1x16x16xf32>
    tpu.vector_store %arg4[%c1_82, %c3_83, %c0_84, %c0_85], %111 {strides = array<i32>} : memref<2x4x16x16xf32, #tpu.memory_space<vmem>>, vector<1x1x16x16xf32>,
    return
  }
  func.func @transform_0(%arg0: i32, %arg1: memref<2xi32, #tpu.memory_space<smem>>, %arg2: memref<2xi32, #tpu.memory_space<smem>>) -> (i32, i32, i32, i32) {
    %c0_i32 = arith.constant 0 : i32
    %c0_i32_0 = arith.constant 0 : i32
    %c0_i32_1 = arith.constant 0 : i32
    %c0_i32_2 = arith.constant 0 : i32
    return %arg0, %c0_i32, %c0_i32_0, %c0_i32_1 : i32, i32, i32, i32
  }
  func.func @transform_1(%arg0: i32, %arg1: memref<2xi32, #tpu.memory_space<smem>>, %arg2: memref<2xi32, #tpu.memory_space<smem>>) -> (i32, i32, i32, i32) {
    %c0_i32 = arith.constant 0 : i32
    %c0_i32_0 = arith.constant 0 : i32
    %c0_i32_1 = arith.constant 0 : i32
    %c0_i32_2 = arith.constant 0 : i32
    return %arg0, %c0_i32, %c0_i32_0, %c0_i32_1 : i32, i32, i32, i32
  }
}

</mosaic_0001>

<bundles_post_ra>
// kernel: tpu_custom_call.1
= control target key start
LH: loop header
LB: loop body
LE: loop exit
PB: predicated region body
PF: predicated region fallthrough
CT: control target
= control target key end

     0   :  { %s1742_s12 = smov [#allocation3]   ;;  %s1969_s0 = inlined_call_operand.hbm [shape: s32[2], index: 0, kind: input, shape index: {}]   ;;  %s1970_s2 = inlined_call_operand.hbm [shape: f32[2,4,16,16], index: 2, kind: input, shape index: {}]   ;;  %s1971_s3 = inlined_call_operand.hbm [shape: f32[2,4,16,16], index: 3, kind: output, shape index: {}]   ;;  %s1972_s1 = inlined_call_operand.vmem [shape: s32[2], index: 1, kind: input, shape index: {}]  }
   0x1   :  { %9 = dma.hbm_to_smem %s1969_s0, 16, %s1742_s12, [#allocation2] }
   0x2   :  { %s10_s17 = sshll.u32 %s1972_s1, 4  ;;  %s11_s17 = int_to_ptr.vmem [resolvable:$true] %s10_s17 }
   0x3   :  { %s1684_s18 = scalar_lea.vmem %s11_s17, 16  ;;  %p1689_p1 = scmp.lt.s32.totalorder %s11_s17, %s11_s17 }
   0x4   :  { %p1685_p0 = scmp.ne.s32.totalorder %s11_s17, %s1684_s18  ;;  %p1690_p2 = scmp.lt.s32.totalorder %s1684_s18, %s1684_s18 }
   0x6   :  { %p1691_p3 = por %p1690_p2, %p1689_p1 }
   0x8   :  { %p1692_p4 = pnand %p1691_p3, %p1685_p0 }
   0xa   :  { %1695 = shalt.err (!%p1692_p4)  }
   0xb   :  { %s1743_s19 = smov [#allocation4]  }
   0xc   :  { %13 = dma.vmem_to_smem %s11_s17, 16, %s1743_s19, [#allocation2] }
   0xd   :  { %1736 = dma.done.wait [#allocation2], 32 }
   0xe   :  { %1737 = vsyncadd [#allocation2], 4294967264 }
   0xf   :  { %15 = sfence }
  0x10   :  { %16 = vsyncpa [#allocation6], 0 }
  0x11   :  { %17 = vsyncpa [#allocation7], 0  ;;  %s1744_s0 = smov [#allocation5]  }
  0x12   :  { %s23_s20 = sshll.u32 %s1744_s0, 4  ;;  %s24_s20 = int_to_ptr.vmem [resolvable:$true] %s23_s20 }
  0x13   :  { %s1704_s21 = scalar_lea.vmem %s24_s20, 2048  ;;  %p1709_p6 = scmp.lt.s32.totalorder %s24_s20, %s24_s20 }
  0x14   :  { %p1705_p5 = scmp.ne.s32.totalorder %s24_s20, %s1704_s21  ;;  %p1710_p7 = scmp.lt.s32.totalorder %s1704_s21, %s1704_s21 }
  0x16   :  { %p1711_p8 = por %p1710_p7, %p1709_p6 }
  0x18   :  { %p1712_p9 = pnand %p1711_p8, %p1705_p5 }
  0x1a   :  { %1715 = shalt.err (!%p1712_p9)
}
  0x1b   :  { %s1745_s1 = smov 128   ;;  %s1746_s22 = smov 8  }
  0x1c   :  { %29 = dma.hbm_to_vmem [thread:$0]  %s1970_s2, 2048, %s24_s20, [#allocation6], %s1745_s1, %s1745_s1, %s1746_s22  }
  0x1d   :  { %1738 = dma.done.wait [#allocation6], 2048  }
  0x1e   :  { %1739 = vsyncadd [#allocation6], 4294965248  ;;  %v33_v0 = vlaneseq  ;;  %s39_s25 = sld [smem:[#allocation3]]  ;;  %v73_v3 = vld [vmem:[#allocation5 + $0x8] sm:$0xff]  ;;  %v72_v4 = vld [vmem:[#allocation5] sm:$0xff]  ;;  %vm74_vm5 = vcmask 130048  }
  0x1f   :  { %s1460_s26 = sld [smem:[#allocation3 + $0x1]]  ;;  %1556 = vmatprep.subr.mxu0 %v73_v3  ;;  %v241_v7 = vld [vmem:[#allocation5 + $0x18] sm:$0xff]  ;;  %v1747_v19 = vmov 0.0   ;;  %v240_v23 = vld [vmem:[#allocation5 + $0x10] sm:$0xff]  ;;  %v403_v25 = vld [vmem:[#allocation5 + $0x28] sm:$0xff]  ;;  %v1748_v32 = vmov 1.0  }
  0x20   :  { %v1782_v1 = vshrl.u32 %v33_v0, 7  ;;  %s41_s27 = sld [smem:[#allocation4]]  ;;  %1557 = vmatpush3.msra.mxu0 %v73_v3  ;;  %v1790_v12 = vand.u32 127, %v33_v0  ;;  %v402_v28 = vld [vmem:[#allocation5 + $0x20] sm:$0xff]  ;;  %v565_v31 = vld [vmem:[#allocation5 + $0x38] sm:$0xff]  ;;  %v564_v33 = vld [vmem:[#allocation5 + $0x30] sm:$0xff] }
  0x21   :  { %1558 = vmatprep.subr.mxu0 %v72_v4  ;;  %v761_v35 = vld [vmem:[#allocation5 + $0x48] sm:$0xff]  ;;  %v760_v37 = vld [vmem:[#allocation5 + $0x40] sm:$0xff]  ;;  %v929_v38 = vld [vmem:[#allocation5 + $0x58] sm:$0xff]  ;;  %s1462_s30 = sld [smem:[#allocation4 + $0x1]]  ;;  %s1749_s5 = smov [#allocation8]  }
  0x22   :  { %v1785_v2 = vadd.s32 8, %v1782_v1  ;;  %1559 = vmatpush3.msra.mxu0 %v72_v4  ;;  %v928_v40 = vld [vmem:[#allocation5 + $0x50] sm:$0xff]  ;;  %v1091_v41 = vld [vmem:[#allocation5 + $0x68] sm:$0xff]  ;;  %v1090_v42 = vld [vmem:[#allocation5 + $0x60] sm:$0xff]  ;;  %s1418_s6 = sshll.u32 %s1749_s5, 4  ;;  %s1419_s6 = int_to_ptr.vmem [resolvable:$true] %s1418_s6 }
  0x23   :  { %1570 = vmatprep.subr.mxu0 %v241_v7  ;;  %v1253_v43 = vld [vmem:[#allocation5 + $0x78] sm:$0xff]  ;;  %v1252_v44 = vld [vmem:[#allocation5 + $0x70] sm:$0xff]  ;;  %s1716_s7 = scalar_lea.vmem %s1419_s6, 2048  ;;  %p1721_p11 = scmp.lt.s32.totalorder %s1419_s6, %s1419_s6 }
  0x24   :  { %s1430_s28 = sadd.s32 4294967286, %s39_s25  ;;  %p1717_p10 = scmp.ne.s32.totalorder %s1419_s6, %s1716_s7 }
  0x25   :  { %v43_v5 = vstv %s1430_s28  ;;  %s1461_s29 = sadd.s32 4294967286, %s1460_s26  ;;  %p1722_p12 = scmp.lt.s32.totalorder %s1716_s7, %s1716_s7 }
  0x26   :  { %v44_v6 = vadd.s32 %v43_v5, %v1782_v1  ;;  %v45_v8 = vadd.s32 %v43_v5, %v1785_v2  ;;  %v730_v9 = vstv %s1461_s29  ;;  %s1431_s2 = sadd.s32 4294967286, %s41_s27 }
  0x27   :  { %v731_v10 = vadd.s32 %v730_v9, %v1782_v1  ;;  %v60_v11 = vstv %s1431_s2  ;;  %v732_v15 = vadd.s32 %v730_v9, %v1785_v2  ;;  %s1463_s4 = sadd.s32 4294967286, %s1462_s30  ;;  %p1723_p13 = por %p1722_p12, %p1721_p11 }
  0x28   :  { %vm46_vm0 = vcmp.gt.s32.totalorder %v44_v6, 0  ;;  %vm48_vm1 = vcmp.gt.s32.totalorder %v45_v8, 0  ;;  %v61_v16 = vadd.s32 %v60_v11, %v1790_v12  ;;  %v747_v46 = vstv %s1463_s4 }
  0x29   :  { %v47_v13 = vsel %vm46_vm0, %v44_v6, 0  ;;  %v49_v14 = vsel %vm48_vm1, %v45_v8, 0  ;;  %vm733_vm4 = vcmp.gt.s32.totalorder %v731_v10, 0  ;;  %vm735_vm8 = vcmp.gt.s32.totalorder %v732_v15, 0  ;;  %p1724_p0 = pnand %p1723_p13, %p1717_p10 }
  0x2a   :  { %vm50_vm2 = vcmp.lt.s32.totalorder %v47_v13, 15  ;;  %vm52_vm3 = vcmp.lt.s32.totalorder %v49_v14, 15  ;;  %v734_v22 = vsel %vm733_vm4, %v731_v10, 0  ;;  %vm62_vm9 = vcmp.gt.s32.totalorder %v61_v16, 0 }
  0x2b   :  { %v51_v17 = vsel %vm50_vm2, %v47_v13, 15  ;;  %v53_v18 = vsel %vm52_vm3, %v49_v14, 15  ;;  %v63_v24 = vsel %vm62_vm9, %v61_v16, 0  ;;  %vm737_vm10 = vcmp.lt.s32.totalorder %v734_v22, 15 }
  0x2c   :  { %vm54_vm6 = vcmp.eq.s32.totalorder %v1790_v12, %v51_v17  ;;  %vm55_vm7 = vcmp.eq.s32.totalorder %v1790_v12, %v53_v18  ;;  %v736_v26 = vsel %vm735_vm8, %v732_v15, 0  ;;  %vm64_vm11 = vcmp.lt.s32.totalorder %v63_v24, 15 }
  0x2d   :  { %v1432_v20 = vsel %vm54_vm6, 1.0, %v1747_v19  ;;  %v1433_v21 = vsel %vm55_vm7, 1.0, %v1747_v19  ;;  %v65_v27 = vsel %vm64_vm11, %v63_v24, 15  ;;  %v738_v30 = vsel %vm737_vm10, %v734_v22, 15 }
  0x2e   :  { %1560 = vmatprep.mubr.msk.f32.mxu0 %vm74_vm5, %v1432_v20  ;;  %vm1800_vm12 = vcmp.eq.s32.totalorder %v1785_v2, %v65_v27  ;;  %vm739_vm13 = vcmp.lt.s32.totalorder %v736_v26, 15  ;;  %vm741_vm14 = vcmp.eq.s32.totalorder %v1790_v12, %v738_v30  ;;  %vm1826_vm0 = vcmp.eq.s32.totalorder %v1782_v1, %v65_v27 }
  0x2f   :  { %1561 = vmatmul.mubr.msk.f32.vlgmr.msra.gmra.mxu0 %vm74_vm5, %v1433_v21  ;;  %1563 = vmatprep.subr.msk.mxu1 %vm1800_vm12, %v1748_v32  ;;  %v740_v34 = vsel %vm739_vm13, %v736_v26, 15  ;;  %v1464_v36 = vsel %vm741_vm14, 1.0, %v1747_v19  ;;  %v748_v47 = vadd.s32 %v747_v46, %v1790_v12 }
  0x30   :  { %1571 = vmatpush3.msra.mxu0 %v241_v7  ;;  %1574 = vmatprep.mubr.msk.f32.mxu0 %vm74_vm5, %v1432_v20  ;;  %vm742_vm15 = vcmp.eq.s32.totalorder %v1790_v12, %v740_v34 }
  0x31   :  { %1572 = vmatprep.subr.mxu0 %v240_v23  ;;  %1564 = vmatpush3.msk.msra.mxu1 %vm1800_vm12, %v1748_v32  ;;  %v1465_v39 = vsel %vm742_vm15, 1.0, %v1747_v19  ;;  %vm749_vm1 = vcmp.gt.s32.totalorder %v748_v47, 0 }
  0x32   :  { %1573 = vmatpush3.msra.mxu0 %v240_v23  ;;  %1565 = vmatprep.subr.msk.mxu1 %vm1826_vm0, %v1748_v32  ;;  %v750_v51 = vsel %vm749_vm1, %v748_v47, 0 }
  0x33   :  { %1584 = vmatprep.subr.mxu0 %v403_v25  ;;  %1575 = vmatmul.mubr.msk.f32.vlgmr.msra.gmra.mxu0 %vm74_vm5, %v1433_v21  ;;  %vm751_vm2 = vcmp.lt.s32.totalorder %v750_v51, 15 }
  0x34   :  { %1585 = vmatpush3.msra.mxu0 %v403_v25  ;;  %1588 = vmatprep.mubr.msk.f32.mxu0 %vm74_vm5, %v1432_v20  ;;  %v752_v55 = vsel %vm751_vm2, %v750_v51, 15 }
  0x35   :  { %1586 = vmatprep.subr.mxu0 %v402_v28  ;;  %1566 = vmatpush3.msk.msra.mxu1 %vm1826_vm0, %v1748_v32  ;;  %vm1874_vm3 = vcmp.eq.s32.totalorder %v1785_v2, %v752_v55  ;;  %vm1886_vm4 = vcmp.eq.s32.totalorder %v1782_v1, %v752_v55 }
  0x36   :  { %1587 = vmatpush3.msra.mxu0 %v402_v28  ;;  %1577 = vmatprep.subr.msk.mxu1 %vm1800_vm12, %v1748_v32 }
  0x37   :  { %1598 = vmatprep.subr.mxu0 %v565_v31  ;;  %1589 = vmatmul.mubr.msk.f32.vlgmr.msra.gmra.mxu0 %vm74_vm5, %v1433_v21 }
  0x38   :  { %1599 = vmatpush3.msra.mxu0 %v565_v31  ;;  %1602 = vmatprep.mubr.msk.f32.mxu0 %vm74_vm5, %v1432_v20 }
  0x39   :  { %1600 = vmatprep.subr.mxu0 %v564_v33 }
  0x3a   :  { %1601 = vmatpush3.msra.mxu0 %v564_v33 }
  0x3b   :  { %1612 = vmatprep.subr.mxu0 %v761_v35  ;;  %1603 = vmatmul.mubr.msk.f32.vlgmr.msra.gmra.mxu0 %vm74_vm5, %v1433_v21 }
  0x3c   :  { %1613 = vmatpush3.msra.mxu0 %v761_v35  ;;  %1616 = vmatprep.mubr.msk.f32.mxu0 %vm74_vm5, %v1464_v36 }
  0x3d   :  { %1614 = vmatprep.subr.mxu0 %v760_v37 }
  0x3e   :  { %1615 = vmatpush3.msra.mxu0 %v760_v37 }
  0x3f   :  { %1626 = vmatprep.subr.mxu0 %v929_v38  ;;  %1617 = vmatmul.mubr.msk.f32.vlgmr.msra.gmra.mxu0 %vm74_vm5, %v1465_v39 }
  0x40   :  { %1627 = vmatpush3.msra.mxu0 %v929_v38  ;;  %1630 = vmatprep.mubr.msk.f32.mxu0 %vm74_vm5, %v1464_v36 }
  0x41   :  { %1628 = vmatprep.subr.mxu0 %v928_v40 }
  0x42   :  { %1629 = vmatpush3.msra.mxu0 %v928_v40 }
  0x43   :  { %1640 = vmatprep.subr.mxu0 %v1091_v41  ;;  %1631 = vmatmul.mubr.msk.f32.vlgmr.msra.gmra.mxu0 %vm74_vm5, %v1465_v39 }
  0x44   :  { %1641 = vmatpush3.msra.mxu0 %v1091_v41  ;;  %1644 = vmatprep.mubr.msk.f32.mxu0 %vm74_vm5, %v1464_v36 }
  0x45   :  { %1642 = vmatprep.subr.mxu0 %v1090_v42 }
  0x46   :  { %1643 = vmatpush3.msra.mxu0 %v1090_v42 }
  0x47   :  { %1654 = vmatprep.subr.mxu0 %v1253_v43  ;;  %1645 = vmatmul.mubr.msk.f32.vlgmr.msra.gmra.mxu0 %vm74_vm5, %v1465_v39 }
  0x48   :  { %1655 = vmatpush3.msra.mxu0 %v1253_v43  ;;  %1658 = vmatprep.mubr.msk.f32.mxu0 %vm74_vm5, %v1464_v36 }
  0x49   :  { %1656 = vmatprep.subr.mxu0 %v1252_v44 }
  0x4a   :  { %1657 = vmatpush3.msra.mxu0 %v1252_v44 }
  0x4b   :  { %1659 = vmatmul.mubr.msk.f32.vlgmr.msra.gmra.mxu0 %vm74_vm5, %v1465_v39 }
  0xef   :  { %v1562_v48 = vpop.f32.mrf.mxu0 }
  0xf1   :  { %v147_v49 = vpop.f32.mrf.mxu0 }
  0xf2   :  { %1567 = vmatprep.mubr.msk.f32.mxu1 %vm74_vm5, %v147_v49 }
  0xf3   :  { %1568 = vmatmul.mubr.msk.f32.vlgmr.msra.gmra.mxu1 %vm74_vm5, %v1562_v48  ;;  %v1576_v50 = vpop.f32.mrf.mxu0 }
  0xf4   :  { %1578 = vmatpush3.msk.msra.mxu1 %vm1800_vm12, %v1748_v32 }
  0xf5   :  { %1579 = vmatprep.subr.msk.mxu1 %vm1826_vm0, %v1748_v32  ;;  %v308_v52 = vpop.f32.mrf.mxu0 }
  0xf6   :  { %1580 = vmatpush3.msk.msra.mxu1 %vm1826_vm0, %v1748_v32  ;;  %1581 = vmatprep.mubr.msk.f32.mxu1 %vm74_vm5, %v308_v52 }
  0xf7   :  { %1591 = vmatprep.subr.msk.mxu1 %vm1800_vm12, %v1748_v32  ;;  %1582 = vmatmul.mubr.msk.f32.vlgmr.msra.gmra.mxu1 %vm74_vm5, %v1576_v50  ;;  %v1590_v53 = vpop.f32.mrf.mxu0 }
  0xf8   :  { %1592 = vmatpush3.msk.msra.mxu1 %vm1800_vm12, %v1748_v32 }
  0xf9   :  { %1593 = vmatprep.subr.msk.mxu1 %vm1826_vm0, %v1748_v32  ;;  %v470_v54 = vpop.f32.mrf.mxu0 }
  0xfa   :  { %1594 = vmatpush3.msk.msra.mxu1 %vm1826_vm0, %v1748_v32  ;;  %1595 = vmatprep.mubr.msk.f32.mxu1 %vm74_vm5, %v470_v54 }
  0xfb   :  { %1605 = vmatprep.subr.msk.mxu1 %vm1800_vm12, %v1748_v32  ;;  %1596 = vmatmul.mubr.msk.f32.vlgmr.msra.gmra.mxu1 %vm74_vm5, %v1590_v53  ;;  %v1604_v56 = vpop.f32.mrf.mxu0 }
  0xfc   :  { %1606 = vmatpush3.msk.msra.mxu1 %vm1800_vm12, %v1748_v32 }
  0xfd   :  { %1607 = vmatprep.subr.msk.mxu1 %vm1826_vm0, %v1748_v32  ;;  %v632_v58 = vpop.f32.mrf.mxu0 }
  0xfe   :  { %1608 = vmatpush3.msk.msra.mxu1 %vm1826_vm0, %v1748_v32  ;;  %1609 = vmatprep.mubr.msk.f32.mxu1 %vm74_vm5, %v632_v58 }
  0xff   :  { %1619 = vmatprep.subr.msk.mxu1 %vm1874_vm3, %v1748_v32  ;;  %1610 = vmatmul.mubr.msk.f32.vlgmr.msra.gmra.mxu1 %vm74_vm5, %v1604_v56  ;;  %v1618_v60 = vpop.f32.mrf.mxu0 }
 0x100   :  { %1620 = vmatpush3.msk.msra.mxu1 %vm1874_vm3, %v1748_v32 }
 0x101   :  { %1621 = vmatprep.subr.msk.mxu1 %vm1886_vm4, %v1748_v32  ;;  %v834_v61 = vpop.f32.mrf.mxu0 }
 0x102   :  { %1622 = vmatpush3.msk.msra.mxu1 %vm1886_vm4, %v1748_v32  ;;  %1623 = vmatprep.mubr.msk.f32.mxu1 %vm74_vm5, %v834_v61 }
 0x103   :  { %1633 = vmatprep.subr.msk.mxu1 %vm1874_vm3, %v1748_v32  ;;  %1624 = vmatmul.mubr.msk.f32.vlgmr.msra.gmra.mxu1 %vm74_vm5, %v1618_v60  ;;  %v1632_v62 = vpop.f32.mrf.mxu0 }
 0x104   :  { %1634 = vmatpush3.msk.msra.mxu1 %vm1874_vm3, %v1748_v32 }
 0x105   :  { %1635 = vmatprep.subr.msk.mxu1 %vm1886_vm4, %v1748_v32  ;;  %v996_v63 = vpop.f32.mrf.mxu0 }
 0x106   :  { %1636 = vmatpush3.msk.msra.mxu1 %vm1886_vm4, %v1748_v32  ;;  %1637 = vmatprep.mubr.msk.f32.mxu1 %vm74_vm5, %v996_v63 }
 0x107   :  { %1647 = vmatprep.subr.msk.mxu1 %vm1874_vm3, %v1748_v32  ;;  %1638 = vmatmul.mubr.msk.f32.vlgmr.msra.gmra.mxu1 %vm74_vm5, %v1632_v62  ;;  %v1646_v0 = vpop.f32.mrf.mxu0 }
 0x108   :  { %1648 = vmatpush3.msk.msra.mxu1 %vm1874_vm3, %v1748_v32 }
 0x109   :  { %1649 = vmatprep.subr.msk.mxu1 %vm1886_vm4, %v1748_v32  ;;  %v1158_v1 = vpop.f32.mrf.mxu0 }
 0x10a   :  { %1650 = vmatpush3.msk.msra.mxu1 %vm1886_vm4, %v1748_v32  ;;  %1651 = vmatprep.mubr.msk.f32.mxu1 %vm74_vm5, %v1158_v1 }
 0x10b   :  { %1661 = vmatprep.subr.msk.mxu1 %vm1874_vm3, %v1748_v32  ;;  %1652 = vmatmul.mubr.msk.f32.vlgmr.msra.gmra.mxu1 %vm74_vm5, %v1646_v0  ;;  %v1660_v2 = vpop.f32.mrf.mxu0 }
 0x10c   :  { %1662 = vmatpush3.msk.msra.mxu1 %vm1874_vm3, %v1748_v32 }
 0x10d   :  { %1663 = vmatprep.subr.msk.mxu1 %vm1886_vm4, %v1748_v32  ;;  %v1320_v3 = vpop.f32.mrf.mxu0 }
 0x10e   :  { %1664 = vmatpush3.msk.msra.mxu1 %vm1886_vm4, %v1748_v32  ;;  %1665 = vmatprep.mubr.msk.f32.mxu1 %vm74_vm5, %v1320_v3 }
 0x10f   :  { %1666 = vmatmul.mubr.msk.f32.vlgmr.msra.gmra.mxu1 %vm74_vm5, %v1660_v2 }
 0x1b3   :  { %v1569_v4 = vpop.f32.mrf.mxu1 }
 0x1b4   :  { %238 = vst.msk [vmem:[#allocation8 + $0x8] sm:$0xff] %vm74_vm5, %v1569_v4 }
 0x1b5   :  { %v228_v5 = vpop.f32.mrf.mxu1 }
 0x1b6   :  { %237 = vst.msk [vmem:[#allocation8] sm:$0xff] %vm74_vm5, %v228_v5 }
 0x1b7   :  { %v1583_v6 = vpop.f32.mrf.mxu1 }
 0x1b8   :  { %400 = vst.msk [vmem:[#allocation8 + $0x18] sm:$0xff] %vm74_vm5, %v1583_v6 }
 0x1b9   :  { %v389_v7 = vpop.f32.mrf.mxu1 }
 0x1ba   :  { %399 = vst.msk [vmem:[#allocation8 + $0x10] sm:$0xff] %vm74_vm5, %v389_v7 }
 0x1bb   :  { %v1597_v8 = vpop.f32.mrf.mxu1 }
 0x1bc   :  { %562 = vst.msk [vmem:[#allocation8 + $0x28] sm:$0xff] %vm74_vm5, %v1597_v8 }
 0x1bd   :  { %v551_v9 = vpop.f32.mrf.mxu1 }
 0x1be   :  { %561 = vst.msk [vmem:[#allocation8 + $0x20] sm:$0xff] %vm74_vm5, %v551_v9 }
 0x1bf   :  { %v1611_v10 = vpop.f32.mrf.mxu1 }
 0x1c0   :  { %724 = vst.msk [vmem:[#allocation8 + $0x38] sm:$0xff] %vm74_vm5, %v1611_v10 }
 0x1c1   :  { %v713_v11 = vpop.f32.mrf.mxu1 }
 0x1c2   :  { %723 = vst.msk [vmem:[#allocation8 + $0x30] sm:$0xff] %vm74_vm5, %v713_v11 }
 0x1c3   :  { %v1625_v12 = vpop.f32.mrf.mxu1 }
 0x1c4   :  { %926 = vst.msk [vmem:[#allocation8 + $0x48] sm:$0xff] %vm74_vm5, %v1625_v12 }
 0x1c5   :  { %v915_v13 = vpop.f32.mrf.mxu1 }
 0x1c6   :  { %925 = vst.msk [vmem:[#allocation8 + $0x40] sm:$0xff] %vm74_vm5, %v915_v13 }
 0x1c7   :  { %v1639_v14 = vpop.f32.mrf.mxu1 }
 0x1c8   :  { %1088 = vst.msk [vmem:[#allocation8 + $0x58] sm:$0xff] %vm74_vm5, %v1639_v14 }
 0x1c9   :  { %v1077_v15 = vpop.f32.mrf.mxu1 }
 0x1ca   :  { %1087 = vst.msk [vmem:[#allocation8 + $0x50] sm:$0xff] %vm74_vm5, %v1077_v15 }
 0x1cb   :  { %v1653_v16 = vpop.f32.mrf.mxu1 }
 0x1cc   :  { %1250 = vst.msk [vmem:[#allocation8 + $0x68] sm:$0xff] %vm74_vm5, %v1653_v16 }
 0x1cd   :  { %v1239_v17 = vpop.f32.mrf.mxu1 }
 0x1ce   :  { %1249 = vst.msk [vmem:[#allocation8 + $0x60] sm:$0xff] %vm74_vm5, %v1239_v17 }
 0x1cf   :  { %v1667_v18 = vpop.f32.mrf.mxu1 }
 0x1d0   :  { %1412 = vst.msk [vmem:[#allocation8 + $0x78] sm:$0xff] %vm74_vm5, %v1667_v18 }
 0x1d1   :  { %v1401_v19 = vpop.f32.mrf.mxu1 }
 0x1d2   :  { %1411 = vst.msk [vmem:[#allocation8 + $0x70] sm:$0xff] %vm74_vm5, %v1401_v19 }
 0x1d3   :  { %1727 = shalt.err (!%p1724_p0)
}
 0x1d4   :  { %1424 = dma.vmem_to_hbm [thread:$0]  %s1419_s6, 2048, %s1971_s3, [#allocation7], %s1745_s1, %s1745_s1, %s1746_s22  }
 0x1d5   :  { %1740 = dma.done.wait [#allocation7], 2048  }
 0x1d6   :  { %1741 = vsyncadd [#allocation7], 4294965248 }
 0x1d7   :  { %1428 = vsyncpa [#allocation6], 1 }
 0x1d8   :  { %1429 = vsyncpa [#allocation7], 1 }

</bundles_post_ra>
